<compile_context>
chip_gen: v5e
topology: v5e:2x2
jax: 0.10.0
libtpu: 0.0.40
codegen_flags: <defaults>
</compile_context>

<pallas_src>
import jax
import jax.numpy as jnp
from jax.experimental import pallas as pl
from jax.experimental.pallas import tpu as pltpu


def _hardsigmoid_kernel(x_ref, o_ref):
    # Compute in f32 (v5e has no bf16 EUP); approx reciprocal keeps the divide
    # on the EUP slot instead of a full-precision recip + extra VPU work.
    x = x_ref[...].astype(jnp.float32)
    y = x * pl.reciprocal(1.0 + jnp.abs(x), approx=True) * 0.5 + 0.5
    o_ref[...] = y.astype(o_ref.dtype)


def hardsigmoid(x: jax.Array, *, target_block_bytes: int = 1 << 20) -> jax.Array:
    """Elementwise softsign-style hard-sigmoid. Accepts any shape (NCHW expected)."""
    orig_shape = x.shape
    orig_dtype = x.dtype
    total = int(x.size)
    if total == 0:
        return x

    itemsize = jnp.dtype(orig_dtype).itemsize
    # dtype-aware sublane multiple: f32 -> 8, bf16/f16 -> 16, int8/fp8 -> 32
    sub = {4: 8, 2: 16, 1: 32}.get(itemsize, 8)

    # Pick the widest lane dim that divides the flat size exactly (no padding
    # copies).  Prefer one that also leaves a sublane-aligned row count.
    candidates = (4096, 2048, 1024, 512, 256, 128)
    lanes = None
    for cand in candidates:
        if total % cand == 0 and (total // cand) % sub == 0:
            lanes = cand
            break
    if lanes is None:
        for cand in candidates:
            if total % cand == 0:
                lanes = cand
                break

    x_flat = jnp.ravel(x)
    if lanes is None:
        # Rare fallback (flat size not a multiple of 128): minimal pad.
        lanes = 128
        pad_unit = sub * lanes
        padded = pl.cdiv(total, pad_unit) * pad_unit
        x_flat = jnp.concatenate(
            [x_flat, jnp.zeros((padded - total,), dtype=orig_dtype)]
        )
    else:
        padded = total

    rows = padded // lanes
    x2d = x_flat.reshape(rows, lanes)

    # ~1 MiB per block buffer, sublane-aligned row tile; ragged last block OK.
    tr = max(sub, (target_block_bytes // (lanes * itemsize)) // sub * sub)
    tr = min(tr, rows)
    grid = (pl.cdiv(rows, tr),)

    out2d = pl.pallas_call(
        _hardsigmoid_kernel,
        out_shape=jax.ShapeDtypeStruct((rows, lanes), orig_dtype),
        grid_spec=pl.GridSpec(
            grid=grid,
            in_specs=[pl.BlockSpec((tr, lanes), lambda i: (i, 0))],
            out_specs=pl.BlockSpec((tr, lanes), lambda i: (i, 0)),
        ),
        compiler_params=pltpu.CompilerParams(
            dimension_semantics=("parallel",),
        ),
    )(x2d)

    out_flat = out2d.reshape(-1)
    if padded != total:
        out_flat = out_flat[:total]
    return out_flat.reshape(orig_shape)


if __name__ == "__main__":
    key = jax.random.PRNGKey(0)
    # Small NCHW input consistent with the module's typical usage.
    x = jax.random.normal(key, (2, 4, 16, 16), dtype=jnp.float32)

    y = jax.block_until_ready(hardsigmoid(x))

    # Reference check in plain JAX (approx reciprocal -> slightly looser tol).
    y_ref = 0.5 * (x / (1.0 + jnp.abs(x))) + 0.5
    assert y.shape == x.shape and y.dtype == x.dtype
    assert float(jnp.max(jnp.abs(y - y_ref))) < 5e-3

    print("KERNEL_OK")
</pallas_src>

<mosaic_0001>
module attributes {stable_mosaic.version = 11 : i64} {
  func.func @_hardsigmoid_kernel(%arg0: i32, %arg1: memref<8x256xf32, #tpu.memory_space<vmem>>, %arg2: memref<8x256xf32, #tpu.memory_space<vmem>>) attributes {dimension_semantics = [#tpu.dimension_semantics<parallel>], iteration_bounds = array<i64: 1>, scalar_prefetch = 0 : i64, scratch_operands = 0 : i64, tpu.core_type = #tpu.core_type<tc>, window_params = [{transform_indices = @transform_0, window_bounds = array<i64: 8, 256>}, {transform_indices = @transform_1, window_bounds = array<i64: 8, 256>}]} {
    %c0 = arith.constant 0 : index
    %c0_0 = arith.constant 0 : index
    %0 = vector.load %arg1[%c0, %c0_0] : memref<8x256xf32, #tpu.memory_space<vmem>>, vector<8x256xf32>
    %1 = math.absf %0 : vector<8x256xf32>
    %cst = arith.constant 1.000000e+00 : f32
    %2 = vector.broadcast %cst : f32 to vector<8x256xf32>
    %3 = arith.addf %2, %1 : vector<8x256xf32>
    %4 = tpu.reciprocal %3 {approx = true} : vector<8x256xf32> -> vector<8x256xf32>
    %5 = arith.mulf %0, %4 : vector<8x256xf32>
    %cst_1 = arith.constant 5.000000e-01 : f32
    %6 = vector.broadcast %cst_1 : f32 to vector<8x256xf32>
    %7 = arith.mulf %5, %6 : vector<8x256xf32>
    %cst_2 = arith.constant 5.000000e-01 : f32
    %8 = vector.broadcast %cst_2 : f32 to vector<8x256xf32>
    %9 = arith.addf %7, %8 : vector<8x256xf32>
    %c0_3 = arith.constant 0 : index
    %c0_4 = arith.constant 0 : index
    %10 = vector.load %arg2[%c0_3, %c0_4] : memref<8x256xf32, #tpu.memory_space<vmem>>, vector<8x256xf32>
    tpu.vector_store %arg2[%c0_3, %c0_4], %9 {strides = array<i32>} : memref<8x256xf32, #tpu.memory_space<vmem>>, vector<8x256xf32>,
    return
  }
  func.func @transform_0(%arg0: i32) -> (i32, i32) {
    %c0_i32 = arith.constant 0 : i32
    %c0_i32_0 = arith.constant 0 : i32
    return %arg0, %c0_i32 : i32, i32
  }
  func.func @transform_1(%arg0: i32) -> (i32, i32) {
    %c0_i32 = arith.constant 0 : i32
    %c0_i32_0 = arith.constant 0 : i32
    return %arg0, %c0_i32 : i32, i32
  }
}

</mosaic_0001>

<bundles_post_ra>
// kernel: tpu_custom_call.1
= control target key start
LH: loop header
LB: loop body
LE: loop exit
PB: predicated region body
PF: predicated region fallthrough
CT: control target
= control target key end

     0   :  { %6 = vsyncpa [#allocation3], 0  ;;  %s132_s0 = inlined_call_operand.hbm [shape: f32[8,256], index: 0, kind: input, shape index: {}]   ;;  %s133_s1 = inlined_call_operand.hbm [shape: f32[8,256], index: 1, kind: output, shape index: {}]  }
   0x1   :  { %7 = vsyncpa [#allocation4], 0  ;;  %s13_s8 = sshll.u32 %s132_s0, 4  ;;  %s114_s9 = smov [#allocation2]   ;;  %s14_s8 = int_to_ptr.hbm [resolvable:$true] %s13_s8 }
   0x2   :  { %s15_s10 = sshll.u32 %s114_s9, 4  ;;  %s16_s10 = int_to_ptr.vmem [resolvable:$true] %s15_s10 }
   0x3   :  { %18 = dma.hbm_to_vmem [thread:$0]  %s14_s8, 256, %s16_s10, [#allocation3]  }
   0x4   :  { %110 = dma.done.wait [#allocation3], 256  }
   0x5   :  { %111 = vsyncadd [#allocation3], 4294967040  ;;  %v23_v0 = vld [vmem:[#allocation2] sm:$0xff]  ;;  %v24_v1 = vld [vmem:[#allocation2 + $0x8] sm:$0xff]  ;;  %s115_s0 = smov [#allocation5]   ;;  %s46_s14 = sshll.u32 %s133_s1, 4  ;;  %s47_s14 = int_to_ptr.hbm [resolvable:$true] %s46_s14 }
   0x6   :  { %v25_v2 = vand.u32 2147483647, %v23_v0  ;;  %v26_v3 = vand.u32 2147483647, %v24_v1  ;;  %s44_s11 = sshll.u32 %s115_s0, 4  ;;  %s45_s11 = int_to_ptr.vmem [resolvable:$true] %s44_s11 }
   0x8   :  { %v27_v4 = vadd.f32 1.0, %v25_v2  ;;  %v28_v5 = vadd.f32 1.0, %v26_v3 }
   0xa   :  { %58 = vrcp.f32 %v27_v4 }
   0xb   :  { %60 = vrcp.f32 %v28_v5 }
  0x10   :  { %v59_v6 = vpop.eup %58 }
  0x11   :  { %v61_v7 = vpop.eup %60  ;;  %v31_v8 = vmul.f32 %v59_v6, %v23_v0 }
  0x12   :  { %v32_v9 = vmul.f32 %v61_v7, %v24_v1 }
  0x13   :  { %v33_v10 = vmul.f32 0.5, %v31_v8 }
  0x14   :  { %v34_v11 = vmul.f32 0.5, %v32_v9 }
  0x15   :  { %v35_v12 = vadd.f32 0.5, %v33_v10 }
  0x16   :  { %v36_v13 = vadd.f32 0.5, %v34_v11 }
  0x17   :  { %37 = vst [vmem:[#allocation5] sm:$0xff] %v35_v12 }
  0x18   :  { %38 = vst [vmem:[#allocation5 + $0x8] sm:$0xff] %v36_v13 }
  0x19   :  { %49 = dma.vmem_to_hbm [thread:$0]  %s45_s11, 256, %s47_s14, [#allocation4]  }
  0x1a   :  { %112 = dma.done.wait [#allocation4], 256  }
  0x1b   :  { %113 = vsyncadd [#allocation4], 4294967040 }
  0x1c   :  { %54 = vsyncpa [#allocation3], 1 }
  0x1d   :  { %55 = vsyncpa [#allocation4], 1 }

</bundles_post_ra>
